<compile_context>
chip_gen: v6e
topology: v6e:2x2x1
jax: 0.10.0
libtpu: 0.0.40
codegen_flags: <defaults>
</compile_context>

<pallas_src>
import functools

import jax
import jax.numpy as jnp
from jax.experimental import pallas as pl
from jax.experimental.pallas import tpu as pltpu


def _maxpool_kernel(x_ref, o_ref, *, KK):
    # x_ref: (KK, tHo, lanes)   o_ref: (tHo, lanes)
    acc = x_ref[0]
    for i in range(1, KK):          # static unroll: KK-1 elementwise VPU maxes
        acc = jnp.maximum(acc, x_ref[i])
    o_ref[...] = acc


def maxpool2d_ceil(x, kernel_size=3, stride=None):
    """Equivalent of torch.nn.MaxPool2d(kernel_size, ceil_mode=True) on NCHW."""
    K = kernel_size
    S = K if stride is None else stride
    assert S == K, "kernel assumes the PyTorch default stride == kernel_size"
    B, C, H, W = x.shape

    def out_size(n):
        o = -(-(n - K) // S) + 1          # ceil_mode output size
        if (o - 1) * S >= n:              # PyTorch drops a window starting past the end
            o -= 1
        return o

    Ho, Wo = out_size(H), out_size(W)
    Hp, Wp = Ho * S, Wo * S               # padded extents (S == K)

    if jnp.issubdtype(x.dtype, jnp.floating):
        neg = jnp.array(-jnp.inf, x.dtype)
    else:
        neg = jnp.array(jnp.iinfo(x.dtype).min, x.dtype)

    # ceil-mode border pad (at most K-1 rows/cols).  Every ceil-mode window
    # contains at least one valid element, so the -inf fill never reaches the
    # output.  Fuses with the layout transpose below into one XLA pass.
    xp = jnp.pad(x, ((0, 0), (0, 0), (0, Hp - H), (0, Wp - W)),
                 constant_values=neg)

    # (B,C,Hp,Wp) -> (K,K,Ho,Wo,B,C) -> (K*K, Ho, Wo*B*C):
    # window offsets leading, everything else flattened onto the lane axis.
    lanes = Wo * B * C
    x_r = (xp.reshape(B, C, Ho, K, Wo, K)
             .transpose(3, 5, 2, 4, 0, 1)
             .reshape(K * K, Ho, lanes))

    # Largest Ho-tile whose input block stays within ~6 MiB of VMEM
    # (double-buffered total ~13 MiB); small inputs use a single grid step.
    itemsize = jnp.dtype(x.dtype).itemsize
    budget = 6 * 1024 * 1024
    rows = max(1, budget // (K * K * lanes * itemsize))
    if rows >= Ho:
        tHo = Ho                                       # full extent (always legal)
    else:
        tHo = min(Ho, max(8, (rows // 8) * 8))         # multiple of 8, <= Ho

    out2d = pl.pallas_call(
        functools.partial(_maxpool_kernel, KK=K * K),
        out_shape=jax.ShapeDtypeStruct((Ho, lanes), x.dtype),
        grid=(pl.cdiv(Ho, tHo),),
        in_specs=[pl.BlockSpec((K * K, tHo, lanes), lambda h: (0, h, 0))],
        out_specs=pl.BlockSpec((tHo, lanes), lambda h: (h, 0)),
        compiler_params=pltpu.CompilerParams(
            dimension_semantics=("parallel",),
            vmem_limit_bytes=32 * 1024 * 1024),
    )(x_r)

    # (Ho, Wo*B*C) -> NCHW
    return out2d.reshape(Ho, Wo, B, C).transpose(2, 3, 0, 1)


if __name__ == "__main__":
    key = jax.random.PRNGKey(0)
    x = jax.random.normal(key, (2, 4, 16, 16), dtype=jnp.float32)

    out = maxpool2d_ceil(x)               # expected shape (2, 4, 6, 6)
    jax.block_until_ready(out)

    # Pure-JAX reference for the same ceil-mode max pool.
    B, C, H, W = x.shape
    K = S = 3
    Ho = Wo = 6
    xp = jnp.pad(x, ((0, 0), (0, 0), (0, Ho * S - H), (0, Wo * S - W)),
                 constant_values=-jnp.inf)
    ref = xp.reshape(B, C, Ho, S, Wo, S).max(axis=(3, 5))

    assert out.shape == (2, 4, 6, 6), out.shape
    assert jnp.allclose(out, ref), "mismatch vs reference"
    print("KERNEL_OK")
</pallas_src>

<mosaic_0001>
module attributes {stable_mosaic.version = 11 : i64} {
  func.func @_maxpool_kernel(%arg0: i32, %arg1: memref<9x6x48xf32, #tpu.memory_space<vmem>>, %arg2: memref<6x48xf32, #tpu.memory_space<vmem>>) attributes {dimension_semantics = [#tpu.dimension_semantics<parallel>], iteration_bounds = array<i64: 1>, scalar_prefetch = 0 : i64, scratch_operands = 0 : i64, tpu.core_type = #tpu.core_type<tc>, window_params = [{transform_indices = @transform_0, window_bounds = array<i64: 9, 6, 48>}, {transform_indices = @transform_1, window_bounds = array<i64: 6, 48>}]} {
    %c0 = arith.constant 0 : index
    %c0_0 = arith.constant 0 : index
    %c0_1 = arith.constant 0 : index
    %0 = vector.load %arg1[%c0, %c0_0, %c0_1] : memref<9x6x48xf32, #tpu.memory_space<vmem>>, vector<1x6x48xf32>
    %1 = vector.shape_cast %0 : vector<1x6x48xf32> to vector<6x48xf32>
    %c1 = arith.constant 1 : index
    %c0_2 = arith.constant 0 : index
    %c0_3 = arith.constant 0 : index
    %2 = vector.load %arg1[%c1, %c0_2, %c0_3] : memref<9x6x48xf32, #tpu.memory_space<vmem>>, vector<1x6x48xf32>
    %3 = vector.shape_cast %2 : vector<1x6x48xf32> to vector<6x48xf32>
    %4 = arith.maximumf %1, %3 : vector<6x48xf32>
    %c2 = arith.constant 2 : index
    %c0_4 = arith.constant 0 : index
    %c0_5 = arith.constant 0 : index
    %5 = vector.load %arg1[%c2, %c0_4, %c0_5] : memref<9x6x48xf32, #tpu.memory_space<vmem>>, vector<1x6x48xf32>
    %6 = vector.shape_cast %5 : vector<1x6x48xf32> to vector<6x48xf32>
    %7 = arith.maximumf %4, %6 : vector<6x48xf32>
    %c3 = arith.constant 3 : index
    %c0_6 = arith.constant 0 : index
    %c0_7 = arith.constant 0 : index
    %8 = vector.load %arg1[%c3, %c0_6, %c0_7] : memref<9x6x48xf32, #tpu.memory_space<vmem>>, vector<1x6x48xf32>
    %9 = vector.shape_cast %8 : vector<1x6x48xf32> to vector<6x48xf32>
    %10 = arith.maximumf %7, %9 : vector<6x48xf32>
    %c4 = arith.constant 4 : index
    %c0_8 = arith.constant 0 : index
    %c0_9 = arith.constant 0 : index
    %11 = vector.load %arg1[%c4, %c0_8, %c0_9] : memref<9x6x48xf32, #tpu.memory_space<vmem>>, vector<1x6x48xf32>
    %12 = vector.shape_cast %11 : vector<1x6x48xf32> to vector<6x48xf32>
    %13 = arith.maximumf %10, %12 : vector<6x48xf32>
    %c5 = arith.constant 5 : index
    %c0_10 = arith.constant 0 : index
    %c0_11 = arith.constant 0 : index
    %14 = vector.load %arg1[%c5, %c0_10, %c0_11] : memref<9x6x48xf32, #tpu.memory_space<vmem>>, vector<1x6x48xf32>
    %15 = vector.shape_cast %14 : vector<1x6x48xf32> to vector<6x48xf32>
    %16 = arith.maximumf %13, %15 : vector<6x48xf32>
    %c6 = arith.constant 6 : index
    %c0_12 = arith.constant 0 : index
    %c0_13 = arith.constant 0 : index
    %17 = vector.load %arg1[%c6, %c0_12, %c0_13] : memref<9x6x48xf32, #tpu.memory_space<vmem>>, vector<1x6x48xf32>
    %18 = vector.shape_cast %17 : vector<1x6x48xf32> to vector<6x48xf32>
    %19 = arith.maximumf %16, %18 : vector<6x48xf32>
    %c7 = arith.constant 7 : index
    %c0_14 = arith.constant 0 : index
    %c0_15 = arith.constant 0 : index
    %20 = vector.load %arg1[%c7, %c0_14, %c0_15] : memref<9x6x48xf32, #tpu.memory_space<vmem>>, vector<1x6x48xf32>
    %21 = vector.shape_cast %20 : vector<1x6x48xf32> to vector<6x48xf32>
    %22 = arith.maximumf %19, %21 : vector<6x48xf32>
    %c8 = arith.constant 8 : index
    %c0_16 = arith.constant 0 : index
    %c0_17 = arith.constant 0 : index
    %23 = vector.load %arg1[%c8, %c0_16, %c0_17] : memref<9x6x48xf32, #tpu.memory_space<vmem>>, vector<1x6x48xf32>
    %24 = vector.shape_cast %23 : vector<1x6x48xf32> to vector<6x48xf32>
    %25 = arith.maximumf %22, %24 : vector<6x48xf32>
    %c0_18 = arith.constant 0 : index
    %c0_19 = arith.constant 0 : index
    %26 = vector.load %arg2[%c0_18, %c0_19] : memref<6x48xf32, #tpu.memory_space<vmem>>, vector<6x48xf32>
    tpu.vector_store %arg2[%c0_18, %c0_19], %25 {strides = array<i32>} : memref<6x48xf32, #tpu.memory_space<vmem>>, vector<6x48xf32>,
    return
  }
  func.func @transform_0(%arg0: i32) -> (i32, i32, i32) {
    %c0_i32 = arith.constant 0 : i32
    %c0_i32_0 = arith.constant 0 : i32
    %c0_i32_1 = arith.constant 0 : i32
    return %c0_i32, %arg0, %c0_i32_0 : i32, i32, i32
  }
  func.func @transform_1(%arg0: i32) -> (i32, i32) {
    %c0_i32 = arith.constant 0 : i32
    %c0_i32_0 = arith.constant 0 : i32
    return %arg0, %c0_i32 : i32, i32
  }
}

</mosaic_0001>

<bundles_post_ra>
// kernel: tpu_custom_call.1
= control target key start
LH: loop header
LB: loop body
LE: loop exit
PB: predicated region body
PF: predicated region fallthrough
CT: control target
= control target key end

     0   :  { %6 = vsyncpa [#allocation3], 0  ;;  %s133_s0 = inlined_call_operand.hbm [shape: f32[9,6,48], index: 0, kind: input, shape index: {}]   ;;  %s134_s1 = inlined_call_operand.hbm [shape: f32[6,48], index: 1, kind: output, shape index: {}]  }
   0x1   :  { %7 = vsyncpa [#allocation4], 0  ;;  %s113_s6 = smov [#allocation2]  }
   0x2   :  { %s13_s7 = sshll.u32 %s113_s6, 4  ;;  %s14_s7 = int_to_ptr.vmem [resolvable:$true] %s13_s7 }
   0x3   :  { %s77_s8 = scalar_lea.vmem %s14_s7, 1152  ;;  %p82_p1 = scmp.lt.s32.totalorder %s14_s7, %s14_s7 }
   0x4   :  { %p78_p0 = scmp.ne.s32.totalorder %s14_s7, %s77_s8  ;;  %p83_p2 = scmp.lt.s32.totalorder %s77_s8, %s77_s8 }
   0x6   :  { %p84_p3 = por %p83_p2, %p82_p1 }
   0x8   :  { %p85_p4 = pnand %p84_p3, %p78_p0 }
   0xa   :  { %88 = shalt.err (!%p85_p4)
}
   0xb   :  { %s114_s9 = smov 128   ;;  %s115_s10 = smov 8  }
   0xc   :  { %19 = dma.hbm_to_vmem [thread:$0]  %s133_s0, 1152, %s14_s7, [#allocation3], %s114_s9, %s114_s9, %s115_s10  }
   0xd   :  { %109 = dma.done.wait [#allocation3], 1152  }
   0xe   :  { %110 = vsyncadd [#allocation3], 4294966144  ;;  %v23_v0 = vld [vmem:[#allocation2] sm:$0x3f]  ;;  %v25_v1 = vld [vmem:[#allocation2 + $0x8] sm:$0x3f] }
   0xf   :  { %v28_v2 = vld [vmem:[#allocation2 + $0x10] sm:$0x3f]  ;;  %v26_v3 = vmax.f32 %v23_v0, %v25_v1  ;;  %v31_v4 = vld [vmem:[#allocation2 + $0x18] sm:$0x3f]  ;;  %v34_v6 = vld [vmem:[#allocation2 + $0x20] sm:$0x3f] }
  0x10   :  { %v37_v8 = vld [vmem:[#allocation2 + $0x28] sm:$0x3f]  ;;  %v40_v10 = vld [vmem:[#allocation2 + $0x30] sm:$0x3f]  ;;  %v43_v12 = vld [vmem:[#allocation2 + $0x38] sm:$0x3f] }
  0x11   :  { %v29_v5 = vmax.f32 %v26_v3, %v28_v2  ;;  %v46_v14 = vld [vmem:[#allocation2 + $0x40] sm:$0x3f]  ;;  %s116_s13 = smov [#allocation5]   ;;  %vm48_vm0 = vcmask 390144  }
  0x12   :  { %s56_s14 = sshll.u32 %s116_s13, 4  ;;  %s57_s14 = int_to_ptr.vmem [resolvable:$true] %s56_s14 }
  0x13   :  { %v32_v7 = vmax.f32 %v29_v5, %v31_v4  ;;  %s89_s0 = scalar_lea.vmem %s57_s14, 128  ;;  %p94_p6 = scmp.lt.s32.totalorder %s57_s14, %s57_s14 }
  0x14   :  { %p90_p5 = scmp.ne.s32.totalorder %s57_s14, %s89_s0  ;;  %p95_p7 = scmp.lt.s32.totalorder %s89_s0, %s89_s0 }
  0x15   :  { %v35_v9 = vmax.f32 %v32_v7, %v34_v6 }
  0x16   :  { %p96_p8 = por %p95_p7, %p94_p6 }
  0x17   :  { %v38_v11 = vmax.f32 %v35_v9, %v37_v8 }
  0x18   :  { %p97_p9 = pnand %p96_p8, %p90_p5 }
  0x19   :  { %v41_v13 = vmax.f32 %v38_v11, %v40_v10 }
  0x1b   :  { %v44_v15 = vmax.f32 %v41_v13, %v43_v12 }
  0x1d   :  { %v47_v16 = vmax.f32 %v44_v15, %v46_v14 }
  0x1f   :  { %49 = vst.msk [vmem:[#allocation5] sm:$0x3f] %vm48_vm0, %v47_v16 }
  0x20   :  { %100 = shalt.err (!%p97_p9)
}
  0x21   :  { %59 = dma.vmem_to_hbm [thread:$0]  %s57_s14, 128, %s134_s1, [#allocation4]  }
  0x22   :  { %111 = dma.done.wait [#allocation4], 128  }
  0x23   :  { %112 = vsyncadd [#allocation4], 4294967168 }
  0x24   :  { %63 = vsyncpa [#allocation3], 1 }
  0x25   :  { %64 = vsyncpa [#allocation4], 1 }

</bundles_post_ra>
